<compile_context>
chip_gen: v7x
topology: tpu7x:2x2x1
jax: 0.10.0
libtpu: 0.0.40
codegen_flags: <defaults>
</compile_context>

<pallas_src>
import functools

import jax
import jax.numpy as jnp
from jax.experimental import pallas as pl
from jax.experimental.pallas import tpu as pltpu


# ---------------------------------------------------------------------------
# Kernels
# ---------------------------------------------------------------------------
def _layernorm_kernel(x_ref, w_ref, b_ref, o_ref, *, eps):
    """Standard path: one row of the tile == one LayerNorm row."""
    x = x_ref[...].astype(jnp.float32)                # (row_tile, hidden)
    u = jnp.mean(x, axis=-1, keepdims=True)           # E[x]
    ex2 = jnp.mean(x * x, axis=-1, keepdims=True)     # E[x^2]  (same sweep as E[x])
    var = jnp.maximum(ex2 - u * u, 0.0)               # biased variance, clamped
    inv = jax.lax.rsqrt(var + eps)                    # EUP rsqrt
    w = w_ref[...].astype(jnp.float32)                # (1, hidden), resident
    b = b_ref[...].astype(jnp.float32)                # (1, hidden), resident
    o_ref[...] = ((x - u) * inv * w + b).astype(o_ref.dtype)


def _layernorm_folded_kernel(x_ref, w_ref, b_ref, s_ref, o_ref, *, eps):
    """Lane-folded path: each kernel row holds `fold` original rows back-to-back
    so the last dim is a dense multiple of 128.  Per-segment mean / E[x^2] are
    computed via a block-diagonal averaging matrix on the MXU and arrive
    already broadcast per element."""
    x = x_ref[...].astype(jnp.float32)                # (row_tile, fold*hidden)
    seg = s_ref[...]                                  # (F, F) block-diag of 1/hidden
    u = jnp.dot(x, seg, preferred_element_type=jnp.float32)        # per-seg mean
    ex2 = jnp.dot(x * x, seg, preferred_element_type=jnp.float32)  # per-seg E[x^2]
    var = jnp.maximum(ex2 - u * u, 0.0)
    inv = jax.lax.rsqrt(var + eps)
    w = w_ref[...].astype(jnp.float32)                # (1, F), weight tiled `fold`x
    b = b_ref[...].astype(jnp.float32)
    o_ref[...] = ((x - u) * inv * w + b).astype(o_ref.dtype)


# ---------------------------------------------------------------------------
# Tiling heuristics
# ---------------------------------------------------------------------------
_KNEE_BYTES = 2 * 1024 * 1024    # tile size at the measured HBM-roofline knee
_CAP_BYTES = 4 * 1024 * 1024     # tile cap (f32-equivalent) -> keeps VMEM headroom
_TARGET_STEPS = 16               # >= 8 grid steps per TensorCore on a 2-TC chip


def _sublane_multiple(dtype) -> int:
    itemsize = jnp.dtype(dtype).itemsize
    if itemsize >= 4:
        return 8
    if itemsize == 2:
        return 16
    return 32


def _vmem_capacity_bytes() -> int:
    try:
        return int(pltpu.get_tpu_info().vmem_capacity_bytes)
    except Exception:
        return 64 * 1024 * 1024  # conservative (v7x per-TensorCore)


def _round_up(v: int, m: int) -> int:
    return ((v + m - 1) // m) * m


def _pick_row_tile(rows: int, hidden: int, dtype) -> int:
    """Bytes-driven row tile: ~2-4 MiB per tile, >= _TARGET_STEPS grid steps
    whenever rows permit, rounded to the sublane multiple."""
    sub = _sublane_multiple(dtype)
    # Size against f32 since the kernel materializes f32 temps of the tile.
    itemsize = max(jnp.dtype(dtype).itemsize, 4)
    bytes_per_row = max(1, hidden * itemsize)

    cap_rows = max(sub, ((_CAP_BYTES // bytes_per_row) // sub) * sub)
    knee_rows = min(cap_rows, _round_up(max(1, _KNEE_BYTES // bytes_per_row), sub))
    depth_rows = _round_up(pl.cdiv(rows, _TARGET_STEPS), sub)

    if rows * bytes_per_row <= _KNEE_BYTES:
        # Whole input is below the knee: split purely for pipeline depth /
        # megacore balance (per-step overhead ~0.35 us is negligible).
        tile = max(sub, min(depth_rows, cap_rows))
    else:
        # Aim for the target depth, but never shrink tiles below the knee and
        # never exceed the byte cap.
        tile = min(max(depth_rows, knee_rows), cap_rows)

    if tile >= rows:
        return rows  # full-extent rows block (always layout-legal)
    return tile


# ---------------------------------------------------------------------------
# Wrapper
# ---------------------------------------------------------------------------
def layer_norm(x, weight, bias, eps=1e-12, *, row_tile=None):
    """LayerNorm over the last axis of x (Pallas TPU kernel)."""
    orig_shape = x.shape
    hidden = orig_shape[-1]
    rows = 1
    for d in orig_shape[:-1]:
        rows *= int(d)
    x2 = x.reshape(rows, hidden)

    # Lane folding: for small hidden, fold k rows into the lane dimension so
    # the output block's last dim is a dense 128 lanes (no masked stores).
    fold = 1
    if hidden < 128 and 128 % hidden == 0:
        k = 128 // hidden
        if rows >= k and rows % k == 0:
            fold = k
    # TODO(synk): hidden that neither divides nor is a multiple of 128 still
    # lowers to lane-sparse masked stores; would need lane padding + masking.

    kr = rows // fold
    kh = fold * hidden
    xk = x2.reshape(kr, kh)

    if row_tile is None:
        rt = _pick_row_tile(kr, kh, x.dtype)
    else:
        rt = int(min(int(row_tile), kr))

    w2 = weight.reshape(1, hidden)
    b2 = bias.reshape(1, hidden)
    args = [xk]
    in_specs = [pl.BlockSpec((rt, kh), lambda i: (i, 0))]

    if fold > 1:
        w2 = jnp.tile(w2, (1, fold))                  # (1, fold*hidden)
        b2 = jnp.tile(b2, (1, fold))
        seg_id = jnp.arange(kh, dtype=jnp.int32) // hidden
        seg = jnp.where(seg_id[:, None] == seg_id[None, :],
                        jnp.float32(1.0 / hidden), jnp.float32(0.0))  # (kh, kh)
        args += [w2, b2, seg]
        in_specs += [
            pl.BlockSpec((1, kh), lambda i: (0, 0)),
            pl.BlockSpec((1, kh), lambda i: (0, 0)),
            pl.BlockSpec((kh, kh), lambda i: (0, 0)),
        ]
        kernel = functools.partial(_layernorm_folded_kernel, eps=eps)
    else:
        args += [w2, b2]
        in_specs += [
            pl.BlockSpec((1, kh), lambda i: (0, 0)),
            pl.BlockSpec((1, kh), lambda i: (0, 0)),
        ]
        kernel = functools.partial(_layernorm_kernel, eps=eps)

    itemsize = jnp.dtype(x.dtype).itemsize
    tile_bytes = rt * kh * itemsize
    # double-buffered in/out tiles + ~4 full-tile f32 temps + params (+ seg).
    needed = (4 * tile_bytes + 4 * rt * kh * 4 + 8 * kh * 4
              + (kh * kh * 4 if fold > 1 else 0))
    cap = _vmem_capacity_bytes()
    vmem_limit = int(min((cap * 3) // 4,
                         max(32 * 1024 * 1024, needed + (2 << 20))))

    cost = pl.CostEstimate(
        flops=int(7 * rows * hidden + (2 * kr * kh * kh if fold > 1 else 0)),
        transcendentals=int(rows),
        bytes_accessed=int(2 * rows * hidden * itemsize
                           + 2 * kh * jnp.dtype(weight.dtype).itemsize
                           + (kh * kh * 4 if fold > 1 else 0)),
    )

    grid = (pl.cdiv(kr, rt),)
    out = pl.pallas_call(
        kernel,
        out_shape=jax.ShapeDtypeStruct((kr, kh), x.dtype),
        grid_spec=pltpu.PrefetchScalarGridSpec(
            num_scalar_prefetch=0,
            grid=grid,
            in_specs=in_specs,
            out_specs=pl.BlockSpec((rt, kh), lambda i: (i, 0)),
        ),
        compiler_params=pltpu.CompilerParams(
            dimension_semantics=("parallel",),
            vmem_limit_bytes=vmem_limit,
        ),
        cost_estimate=cost,
    )(*args)

    return out.reshape(orig_shape)


# ---------------------------------------------------------------------------
# Reference + self-test
# ---------------------------------------------------------------------------
def _reference(x, weight, bias, eps):
    u = jnp.mean(x, axis=-1, keepdims=True)
    s = jnp.mean((x - u) ** 2, axis=-1, keepdims=True)
    return weight * ((x - u) / jnp.sqrt(s + eps)) + bias


if __name__ == "__main__":
    key = jax.random.PRNGKey(0)
    k1, k2, k3, k4, k5 = jax.random.split(key, 5)

    # Case 1: module-spec shapes (batch, seq, hidden) with default param init.
    # hidden=32 < 128 -> exercises the lane-folded (MXU segmented-mean) path.
    batch, seq, hidden = 2, 8, 32
    x = jax.random.normal(k1, (batch, seq, hidden), dtype=jnp.float32)
    weight = jnp.ones((hidden,), dtype=jnp.float32)   # nn.Parameter(torch.ones)
    bias = jnp.zeros((hidden,), dtype=jnp.float32)    # nn.Parameter(torch.zeros)
    y = layer_norm(x, weight, bias, eps=1e-12)
    jax.block_until_ready(y)
    ref = _reference(x, weight, bias, 1e-12)
    assert jnp.allclose(y, ref, atol=1e-5, rtol=1e-5), "mismatch (case 1: folded)"

    # Case 2: standard path — ragged last block, lane-dense hidden,
    # non-trivial affine params.
    rows2, hidden2 = 21, 128
    x2 = jax.random.normal(k2, (rows2, hidden2), dtype=jnp.float32)
    w2 = 1.0 + 0.1 * jax.random.normal(k3, (hidden2,), dtype=jnp.float32)
    b2 = 0.1 * jnp.arange(hidden2, dtype=jnp.float32)
    y2 = layer_norm(x2, w2, b2, eps=1e-12)
    jax.block_until_ready(y2)
    ref2 = _reference(x2, w2, b2, 1e-12)
    assert jnp.allclose(y2, ref2, atol=1e-5, rtol=1e-5), "mismatch (case 2: standard)"

    # Case 3: folded path with non-trivial affine params (hidden=64 -> fold=2).
    x3 = jax.random.normal(k4, (3, 8, 64), dtype=jnp.float32)
    w3 = 1.0 + 0.05 * jax.random.normal(k5, (64,), dtype=jnp.float32)
    b3 = 0.01 * jnp.arange(64, dtype=jnp.float32)
    y3 = layer_norm(x3, w3, b3, eps=1e-12)
    jax.block_until_ready(y3)
    ref3 = _reference(x3, w3, b3, 1e-12)
    assert jnp.allclose(y3, ref3, atol=1e-5, rtol=1e-5), "mismatch (case 3: folded affine)"

    print("KERNEL_OK")
</pallas_src>

<mosaic_0001>
module attributes {stable_mosaic.version = 11 : i64} {
  func.func @_layernorm_folded_kernel(%arg0: i32, %arg1: memref<4x128xf32, #tpu.memory_space<vmem>>, %arg2: memref<1x128xf32, #tpu.memory_space<vmem>>, %arg3: memref<1x128xf32, #tpu.memory_space<vmem>>, %arg4: memref<128x128xf32, #tpu.memory_space<vmem>>, %arg5: memref<4x128xf32, #tpu.memory_space<vmem>>) attributes {dimension_semantics = [#tpu.dimension_semantics<parallel>], iteration_bounds = array<i64: 1>, scalar_prefetch = 0 : i64, scratch_operands = 0 : i64, tpu.core_type = #tpu.core_type<tc>, window_params = [{transform_indices = @transform_0, window_bounds = array<i64: 4, 128>}, {pipeline_mode = #tpu.pipeline_mode<synchronous>, transform_indices = @transform_1, window_bounds = array<i64: 1, 128>}, {pipeline_mode = #tpu.pipeline_mode<synchronous>, transform_indices = @transform_2, window_bounds = array<i64: 1, 128>}, {pipeline_mode = #tpu.pipeline_mode<synchronous>, transform_indices = @transform_3, window_bounds = array<i64: 128, 128>}, {transform_indices = @transform_4, window_bounds = array<i64: 4, 128>}]} {
    %c0 = arith.constant 0 : index
    %c0_0 = arith.constant 0 : index
    %0 = vector.load %arg1[%c0, %c0_0] : memref<4x128xf32, #tpu.memory_space<vmem>>, vector<4x128xf32>
    %c0_1 = arith.constant 0 : index
    %c0_2 = arith.constant 0 : index
    %1 = vector.load %arg4[%c0_1, %c0_2] : memref<128x128xf32, #tpu.memory_space<vmem>>, vector<128x128xf32>
    %cst = arith.constant dense<0.000000e+00> : vector<4x128xf32>
    %2 = tpu.matmul %0, %1, %cst {dimension_numbers = #tpu.dot_dimension_numbers<[1], [0], [0], [1], [0, 0, 1, 1], [], []>} : vector<4x128xf32>, vector<128x128xf32>, vector<4x128xf32> -> vector<4x128xf32>
    %3 = arith.mulf %0, %0 : vector<4x128xf32>
    %cst_3 = arith.constant dense<0.000000e+00> : vector<4x128xf32>
    %4 = tpu.matmul %3, %1, %cst_3 {dimension_numbers = #tpu.dot_dimension_numbers<[1], [0], [0], [1], [0, 0, 1, 1], [], []>} : vector<4x128xf32>, vector<128x128xf32>, vector<4x128xf32> -> vector<4x128xf32>
    %5 = arith.mulf %2, %2 : vector<4x128xf32>
    %6 = arith.subf %4, %5 : vector<4x128xf32>
    %cst_4 = arith.constant 0.000000e+00 : f32
    %7 = vector.broadcast %cst_4 : f32 to vector<4x128xf32>
    %8 = arith.maximumf %6, %7 : vector<4x128xf32>
    %cst_5 = arith.constant 9.99999996E-13 : f32
    %9 = vector.broadcast %cst_5 : f32 to vector<4x128xf32>
    %10 = arith.addf %8, %9 : vector<4x128xf32>
    %11 = math.rsqrt %10 : vector<4x128xf32>
    %c0_6 = arith.constant 0 : index
    %c0_7 = arith.constant 0 : index
    %12 = vector.load %arg2[%c0_6, %c0_7] : memref<1x128xf32, #tpu.memory_space<vmem>>, vector<1x128xf32>
    %c0_8 = arith.constant 0 : index
    %c0_9 = arith.constant 0 : index
    %13 = vector.load %arg3[%c0_8, %c0_9] : memref<1x128xf32, #tpu.memory_space<vmem>>, vector<1x128xf32>
    %14 = arith.subf %0, %2 : vector<4x128xf32>
    %15 = arith.mulf %14, %11 : vector<4x128xf32>
    %16 = vector.broadcast %12 : vector<1x128xf32> to vector<4x128xf32>
    %17 = arith.mulf %15, %16 : vector<4x128xf32>
    %18 = vector.broadcast %13 : vector<1x128xf32> to vector<4x128xf32>
    %19 = arith.addf %17, %18 : vector<4x128xf32>
    %c0_10 = arith.constant 0 : index
    %c0_11 = arith.constant 0 : index
    %20 = vector.load %arg5[%c0_10, %c0_11] : memref<4x128xf32, #tpu.memory_space<vmem>>, vector<4x128xf32>
    tpu.vector_store %arg5[%c0_10, %c0_11], %19 {strides = array<i32>} : memref<4x128xf32, #tpu.memory_space<vmem>>, vector<4x128xf32>,
    return
  }
  func.func @transform_0(%arg0: i32) -> (i32, i32) {
    %c0_i32 = arith.constant 0 : i32
    %c0_i32_0 = arith.constant 0 : i32
    return %arg0, %c0_i32 : i32, i32
  }
  func.func @transform_1(%arg0: i32) -> (i32, i32) {
    %c0_i32 = arith.constant 0 : i32
    %c0_i32_0 = arith.constant 0 : i32
    %c0_i32_1 = arith.constant 0 : i32
    return %c0_i32, %c0_i32_0 : i32, i32
  }
  func.func @transform_2(%arg0: i32) -> (i32, i32) {
    %c0_i32 = arith.constant 0 : i32
    %c0_i32_0 = arith.constant 0 : i32
    %c0_i32_1 = arith.constant 0 : i32
    return %c0_i32, %c0_i32_0 : i32, i32
  }
  func.func @transform_3(%arg0: i32) -> (i32, i32) {
    %c0_i32 = arith.constant 0 : i32
    %c0_i32_0 = arith.constant 0 : i32
    %c0_i32_1 = arith.constant 0 : i32
    return %c0_i32, %c0_i32_0 : i32, i32
  }
  func.func @transform_4(%arg0: i32) -> (i32, i32) {
    %c0_i32 = arith.constant 0 : i32
    %c0_i32_0 = arith.constant 0 : i32
    return %arg0, %c0_i32 : i32, i32
  }
}

</mosaic_0001>

<bundles_post_ra>
// kernel: tpu_custom_call.1
= control target key start
LH: loop header
LB: loop body
LE: loop exit
PB: predicated region body
PF: predicated region fallthrough
CT: control target
= control target key end

     0   :  { %9 = vsyncpa [#allocation3], 0  ;;  %s560_s0 = inlined_call_operand.hbm [shape: f32[4,128], index: 0, kind: input, shape index: {}]   ;;  %s561_s1 = inlined_call_operand.vmem [shape: f32[1,128], index: 1, kind: input, shape index: {}]   ;;  %s562_s2 = inlined_call_operand.vmem [shape: f32[1,128], index: 2, kind: input, shape index: {}]   ;;  %s563_s3 = inlined_call_operand.hbm [shape: f32[128,128], index: 3, kind: input, shape index: {}]   ;;  %s564_s4 = inlined_call_operand.hbm [shape: f32[4,128], index: 4, kind: output, shape index: {}]  }
   0x1   :  { %10 = vsyncpa [#allocation6], 0 }
   0x2   :  { %11 = vsyncpa [#allocation4], 0  ;;  %s478_s15 = smov [#allocation2]   ;;  %s479_s17 = smov [#allocation5]  }
   0x3   :  { %s18_s16 = sshll.u32 %s478_s15, 4  ;;  %s31_s18 = sshll.u32 %s479_s17, 4  ;;  %s19_s16 = int_to_ptr.vmem [resolvable:$true] %s18_s16  ;;  %s511_s18 = int_to_ptr.vmem [resolvable:$true] %s31_s18 }
   0x4   :  { %s406_s21 = scalar_lea.hbm %s560_s0, 64 }
   0x5   :  { %p407_p0 = scmp.ne.s32.totalorder %s560_s0, %s406_s21  ;;  %p410_p1 = scmp.lt.u32.totalorder %s406_s21, %s560_s0 }
   0x7   :  { %p412_p2 = pnand %p410_p1, %p407_p0 }
   0x9   :  { %415 = shalt.err (!%p412_p2)
}
   0xa   :  { %s416_s26 = scalar_lea.vmem %s19_s16, 64  ;;  %p421_p4 = scmp.lt.s32.totalorder %s19_s16, %s19_s16 }
   0xb   :  { %p417_p3 = scmp.ne.s32.totalorder %s19_s16, %s416_s26  ;;  %p422_p5 = scmp.lt.s32.totalorder %s416_s26, %s416_s26 }
   0xd   :  { %p423_p6 = por %p422_p5, %p421_p4 }
   0xf   :  { %p424_p7 = pnand %p423_p6, %p417_p3 }
  0x11   :  { %427 = shalt.err (!%p424_p7)
}
  0x12   :  { %21 = dma.hbm_to_vmem [thread:$0]  %s560_s0, 64, %s19_s16, [#allocation3]  }
  0x13   :  { %s428_s5 = scalar_lea.hbm %s563_s3, 2048 }
  0x14   :  { %p429_p8 = scmp.ne.s32.totalorder %s563_s3, %s428_s5  ;;  %p432_p9 = scmp.lt.u32.totalorder %s428_s5, %s563_s3 }
  0x16   :  { %p434_p10 = pnand %p432_p9, %p429_p8 }
  0x18   :  { %437 = shalt.err (!%p434_p10)
}
  0x19   :  { %s438_s10 = scalar_lea.vmem %s511_s18, 2048  ;;  %p443_p12 = scmp.lt.s32.totalorder %s511_s18, %s511_s18 }
  0x1a   :  { %p439_p11 = scmp.ne.s32.totalorder %s511_s18, %s438_s10  ;;  %p444_p13 = scmp.lt.s32.totalorder %s438_s10, %s438_s10 }
  0x1c   :  { %p445_p0 = por %p444_p13, %p443_p12 }
  0x1e   :  { %p446_p1 = pnand %p445_p0, %p439_p11 }
  0x20   :  { %449 = shalt.err (!%p446_p1)
}
  0x21   :  { %s480_s0 = smov 128   ;;  %s481_s11 = smov 8  }
  0x22   :  { %37 = dma.hbm_to_vmem [thread:$0]  %s563_s3, 2048, %s511_s18, [#allocation6], %s480_s0, %s480_s0, %s481_s11  }
  0x23   :  { %472 = dma.done.wait [#allocation3], 64  }
  0x24   :  { %473 = vsyncadd [#allocation3], 4294967232 }
  0x25   :  { %474 = dma.done.wait [#allocation6], 2048  }
  0x26   :  { %475 = vsyncadd [#allocation6], 4294965248  ;;  %v482_v0 = vmov 0.0|0.0   ;;  %vm483_vm0 = vmmov 0   ;;  %v484_v1 = vmov 0.0   ;;  %v45_v2 = vld [vmem:[#allocation5] sm:$0xff] }
  0x27   :  { %348 = vmatprep.subr.bf16.mxu0 %v482_v0  ;;  %372 = vmatprep.subr.bf16.mxu1 %v482_v0  ;;  %v46_v3 = vld [vmem:[#allocation5 + $0x8] sm:$0xff]  ;;  %v47_v4 = vld [vmem:[#allocation5 + $0x10] sm:$0xff]  ;;  %v48_v6 = vld [vmem:[#allocation5 + $0x18] sm:$0xff]  ;;  %s485_s17 = smov [#allocation7]  }
  0x28   :  { %310 = vmatprep.mubr.msk.f32.mxu0 %vm483_vm0, %v484_v1  ;;  %345 = vmatprep.mubr.msk.f32.mxu1 %vm483_vm0, %v484_v1  ;;  %v349_v5 = vpack.c.bf16 %v46_v3, %v45_v2  ;;  %v352_v7 = vpack.c.bf16 %v48_v6, %v47_v4  ;;  %v49_v8 = vld [vmem:[#allocation5 + $0x20] sm:$0xff]  ;;  %v50_v9 = vld [vmem:[#allocation5 + $0x28] sm:$0xff]  ;;  %v51_v11 = vld [vmem:[#allocation5 + $0x30] sm:$0xff]  ;;  %s232_s18 = sshll.u32 %s485_s17, 4  ;;  %s233_s18 = int_to_ptr.vmem [resolvable:$true] %s232_s18 }
  0x29   :  { %v355_v10 = vpack.c.bf16 %v50_v9, %v49_v8  ;;  %v52_v12 = vld [vmem:[#allocation5 + $0x38] sm:$0xff]  ;;  %v53_v14 = vld [vmem:[#allocation5 + $0x40] sm:$0xff]  ;;  %v54_v15 = vld [vmem:[#allocation5 + $0x48] sm:$0xff]  ;;  %s450_s19 = scalar_lea.vmem %s233_s18, 64  ;;  %p455_p3 = scmp.lt.s32.totalorder %s233_s18, %s233_s18 }
  0x2a   :  { %350 = vmatpush3.bf16.msra.mxu0 %v349_v5  ;;  %374 = vmatpush3.bf16.msra.mxu1 %v349_v5  ;;  %v358_v13 = vpack.c.bf16 %v52_v12, %v51_v11  ;;  %v361_v16 = vpack.c.bf16 %v54_v15, %v53_v14  ;;  %v55_v17 = vld [vmem:[#allocation5 + $0x50] sm:$0xff]  ;;  %v56_v18 = vld [vmem:[#allocation5 + $0x58] sm:$0xff]  ;;  %v57_v20 = vld [vmem:[#allocation5 + $0x60] sm:$0xff]  ;;  %p451_p2 = scmp.ne.s32.totalorder %s233_s18, %s450_s19  ;;  %p456_p4 = scmp.lt.s32.totalorder %s450_s19, %s450_s19 }
  0x2b   :  { %351 = vmatprep.subr.bf16.mxu0 %v482_v0  ;;  %375 = vmatprep.subr.bf16.mxu1 %v482_v0  ;;  %v364_v19 = vpack.c.bf16 %v56_v18, %v55_v17  ;;  %v58_v21 = vld [vmem:[#allocation5 + $0x68] sm:$0xff]  ;;  %v59_v23 = vld [vmem:[#allocation5 + $0x70] sm:$0xff]  ;;  %v60_v24 = vld [vmem:[#allocation5 + $0x78] sm:$0xff] }
  0x2c   :  { %v367_v22 = vpack.c.bf16 %v58_v21, %v57_v20  ;;  %v370_v25 = vpack.c.bf16 %v60_v24, %v59_v23  ;;  %v44_v26 = vld [vmem:[#allocation2] sm:$0xf]  ;;  %p457_p5 = por %p456_p4, %p455_p3 }
  0x2d   :  { %v131_v27 = vmul.f32 %v44_v26, %v44_v26  ;;  %v242_v38 = vld [vmem:[%s561_s1] ss:$0 sm:$0xff] }
  0x2e   :  { %353 = vmatpush3.bf16.msra.mxu0 %v352_v7  ;;  %377 = vmatpush3.bf16.msra.mxu1 %v352_v7  ;;  %v243_v40 = vld [vmem:[%s562_s2] ss:$0 sm:$0xff]  ;;  %p458_p6 = pnand %p457_p5, %p451_p2 }
  0x2f   :  { %354 = vmatprep.subr.bf16.mxu0 %v482_v0  ;;  %378 = vmatprep.subr.bf16.mxu1 %v482_v0 }
  0x32   :  { %356 = vmatpush3.bf16.msra.mxu0 %v355_v10  ;;  %380 = vmatpush3.bf16.msra.mxu1 %v355_v10 }
  0x33   :  { %357 = vmatprep.subr.bf16.mxu0 %v482_v0  ;;  %381 = vmatprep.subr.bf16.mxu1 %v482_v0 }
  0x36   :  { %359 = vmatpush3.bf16.msra.mxu0 %v358_v13  ;;  %383 = vmatpush3.bf16.msra.mxu1 %v358_v13 }
  0x37   :  { %360 = vmatprep.subr.bf16.mxu0 %v482_v0  ;;  %384 = vmatprep.subr.bf16.mxu1 %v482_v0 }
  0x3a   :  { %362 = vmatpush3.bf16.msra.mxu0 %v361_v16  ;;  %386 = vmatpush3.bf16.msra.mxu1 %v361_v16 }
  0x3b   :  { %363 = vmatprep.subr.bf16.mxu0 %v482_v0  ;;  %387 = vmatprep.subr.bf16.mxu1 %v482_v0 }
  0x3e   :  { %365 = vmatpush3.bf16.msra.mxu0 %v364_v19  ;;  %389 = vmatpush3.bf16.msra.mxu1 %v364_v19 }
  0x3f   :  { %366 = vmatprep.subr.bf16.mxu0 %v482_v0  ;;  %390 = vmatprep.subr.bf16.mxu1 %v482_v0 }
  0x42   :  { %368 = vmatpush3.bf16.msra.mxu0 %v367_v22  ;;  %392 = vmatpush3.bf16.msra.mxu1 %v367_v22 }
  0x43   :  { %369 = vmatprep.subr.bf16.mxu0 %v482_v0  ;;  %393 = vmatprep.subr.bf16.mxu1 %v482_v0 }
  0x46   :  { %371 = vmatpush3.bf16.msra.mxu0 %v370_v25  ;;  %395 = vmatpush3.bf16.msra.mxu1 %v370_v25 }
  0x49   :  { %311 = vmatmul.mubr.f32.vlgmr.msra.gmra.mrb[0].mxu0 %v44_v26  ;;  %346 = vmatmul.mubr.f32.vlgmr.msra.gmra.mrb[0].mxu1 %v131_v27 }
 0x11c   :  { %v127_v28 = vpop.f32.mrb[0].mxu0  ;;  %v198_v29 = vpop.f32.mrb[0].mxu1 }
 0x11d   :  { %v202_v30 = vmul.f32 %v127_v28, %v127_v28  ;;  %v312_v31 = vpop.f32.mrb[1].mxu0  ;;  %v347_v32 = vpop.f32.mrb[1].mxu1  ;;  %v209_v36 = vsub.f32 %v44_v26, %v127_v28 }
 0x11f   :  { %v203_v33 = vsub.f32 %v198_v29, %v202_v30 }
 0x121   :  { %v204_v34 = vmax.f32 %v203_v33, 0.0 }
 0x123   :  { %v205_v35 = vadd.f32 1e-12, %v204_v34 }
 0x125   :  { %404 = vrsqrt.f32 %v205_v35 }
 0x12f   :  { %v405_v37 = vpop.eup %404 }
 0x130   :  { %v210_v39 = vmul.f32 %v405_v37, %v209_v36 }
 0x132   :  { %v217_v41 = vmul.f32 %v242_v38, %v210_v39 }
 0x134   :  { %v224_v42 = vadd.f32 %v243_v40, %v217_v41 }
 0x136   :  { %225 = vst [vmem:[#allocation7] sm:$0xf] %v224_v42 }
 0x137   :  { %461 = shalt.err (!%p458_p6)
}
 0x138   :  { %s462_s21 = scalar_lea.hbm %s564_s4, 64 }
 0x139   :  { %p463_p7 = scmp.ne.s32.totalorder %s564_s4, %s462_s21  ;;  %p466_p8 = scmp.lt.u32.totalorder %s462_s21, %s564_s4 }
 0x13b   :  { %p468_p9 = pnand %p466_p8, %p463_p7 }
 0x13d   :  { %471 = shalt.err (!%p468_p9)
}
 0x13e   :  { %235 = dma.vmem_to_hbm [thread:$0]  %s233_s18, 64, %s564_s4, [#allocation4]  }
 0x13f   :  { %476 = dma.done.wait [#allocation4], 64  }
 0x140   :  { %477 = vsyncadd [#allocation4], 4294967232 }
 0x141   :  { %239 = vsyncpa [#allocation3], 1 }
 0x142   :  { %240 = vsyncpa [#allocation6], 1 }
 0x143   :  { %241 = vsyncpa [#allocation4], 1 }

</bundles_post_ra>
